<compile_context>
chip_gen: v7x
topology: tpu7x:2x2x1
jax: 0.10.0
libtpu: 0.0.40
codegen_flags: <defaults>
</compile_context>

<pallas_src>
import jax
import jax.numpy as jnp
import numpy as np
from jax.experimental import pallas as pl
from jax.experimental.pallas import tpu as pltpu

BN_EPS = 1e-5


def _round_up(x, m):
    return (x + m - 1) // m * m


def _make_kernel(C, Wp, n_valid, eps):
    """Kernel factory; C = channels, Wp = padded width, n_valid = N*H*W."""
    inv_n = 1.0 / float(n_valid)

    def kernel(fp_ref, wm_ref, aux_ref, out_ref, tap_ref):
        # fp_ref:  (C, L)    zero-padded activations, padded-flat pixels on lanes
        # wm_ref:  (C+1, L)  rows 0..C-1 / cols 0..9C-1: fused 3x3 tap weights;
        #                    row C: 1.0-mask of valid (conv-center) pixel positions
        # aux_ref: (C, 4)    columns = [gamma, beta, w2, b2]
        # out_ref: (1, L)    lane-dense output slab (padded-flat pixel coords)
        # tap_ref: (9C, L)   VMEM scratch for the in-kernel im2col tap matrix
        L = fp_ref.shape[1]
        fp = fp_ref[...]

        # ---- in-kernel im2col: 9 static lane rotations (XLU), zero HBM traffic ----
        t = 0
        for kh in range(3):
            for kw in range(3):
                delta = (kh - 1) * Wp + (kw - 1)      # tap offset in padded-flat coords
                amt = (-delta) % L
                tap = fp if amt == 0 else pltpu.roll(fp, shift=amt, axis=1)
                tap_ref[t * C:(t + 1) * C, :] = tap
                t += 1

        # ---- Conv2d(C, C, k=3, s=1, p=1): one fused MXU matmul over all 9 taps ----
        w1 = wm_ref[0:C, 0:9 * C]                     # (C, 9C)
        acc = jnp.dot(w1, tap_ref[...], preferred_element_type=jnp.float32)   # (C, L)

        # ---- BatchNorm2d (training-mode batch stats) over the valid pixels only ----
        # Two-pass variance: mean, then centered sum of squares (no cancellation).
        mask = wm_ref[C:C + 1, :]                     # (1, L)
        mean = jnp.sum(acc * mask, axis=-1, keepdims=True) * inv_n            # (C, 1)
        cen = (acc - mean) * mask
        var = jnp.sum(cen * cen, axis=-1, keepdims=True) * inv_n              # biased
        gamma = aux_ref[:, 0:1]
        beta = aux_ref[:, 1:2]
        scale = gamma * jax.lax.rsqrt(var + eps)      # rsqrt -> EUP
        shift = beta - mean * scale

        # ---- folded affine + ReLU (one FMA + max) ----
        y = jnp.maximum(acc * scale + shift, 0.0)                             # (C, L)

        # ---- Conv2d(C, 1, k=1): VPU multiply + cross-sublane reduce (no second
        #      MXU round-trip on the latency-bound path) ----
        w2 = aux_ref[:, 2:3]                          # (C, 1)
        b2 = aux_ref[0:1, 3:4]                        # (1, 1)
        out = jnp.sum(y * w2, axis=0, keepdims=True) + b2                     # (1, L)
        out_ref[...] = out.astype(out_ref.dtype)

    return kernel


def make_prediction_head_params(w1, b1, gamma, beta, w2, b2, *, batch, height, width):
    """Precompute all call-invariant operand blocks (hoisted out of the per-call path)."""
    C = w1.shape[0]
    Hp, Wp = height + 2, width + 2
    L = _round_up(batch * Hp * Wp, 128)

    # Fused (C, 9C) tap-ordered 3x3 conv weights, tap order t = kh*3 + kw.
    w1_taps = jnp.concatenate(
        [w1[:, :, kh, kw] for kh in range(3) for kw in range(3)], axis=1)
    w1_taps = jnp.pad(w1_taps.astype(jnp.float32), ((0, 0), (0, L - 9 * C)))

    # 1.0-mask of valid conv-center positions on the padded-flat pixel axis.
    idx = np.arange(L)
    n_, r = idx // (Hp * Wp), idx % (Hp * Wp)
    hp, wp = r // Wp, r % Wp
    valid = (n_ < batch) & (hp >= 1) & (hp <= height) & (wp >= 1) & (wp <= width)
    mask = jnp.asarray(valid[None, :].astype(np.float32))            # (1, L)

    wm = jnp.concatenate([w1_taps, mask], axis=0)                    # (C+1, L)

    # Per-channel params packed into a single tiny block: [gamma, beta, w2, b2].
    aux = jnp.stack(
        [gamma.astype(jnp.float32), beta.astype(jnp.float32),
         w2[:, :, 0, 0].reshape(-1).astype(jnp.float32),
         jnp.full((C,), b2[0], jnp.float32)], axis=1)                # (C, 4)

    # b1 intentionally unused: cancels exactly under training-mode BN (batch stats).
    del b1
    return wm, aux


@jax.jit
def prediction_head(x, wm, aux):
    """x: (N, C, H, W) f32.  wm/aux from make_prediction_head_params (call-invariant)."""
    N, C, H, W = x.shape
    Hp, Wp = H + 2, W + 2
    L = wm.shape[1]
    n_valid = N * H * W

    # Per-call layout glue (plain XLA, ~1x input HBM traffic): channel-major,
    # zero-pad the 3x3 halo, flatten (N, Hp, Wp) pixels onto the lane axis.
    x_cm = jnp.transpose(x, (1, 0, 2, 3))                            # (C, N, H, W)
    x_pad = jnp.pad(x_cm, ((0, 0), (0, 0), (1, 1), (1, 1)))          # (C, N, Hp, Wp)
    fp = jnp.pad(x_pad.reshape(C, N * Hp * Wp).astype(jnp.float32),
                 ((0, 0), (0, L - N * Hp * Wp)))                     # (C, L)

    flops = 2 * C * 9 * C * L + 10 * C * L
    bytes_accessed = 4 * (C * L + (C + 1) * L + 4 * C + L)

    out_flat = pl.pallas_call(
        _make_kernel(C, Wp, n_valid, BN_EPS),
        out_shape=jax.ShapeDtypeStruct((1, L), jnp.float32),
        grid=(1,),
        in_specs=[
            pl.BlockSpec((C, L), lambda i: (0, 0)),
            pl.BlockSpec((C + 1, L), lambda i: (0, 0)),
            pl.BlockSpec((C, 4), lambda i: (0, 0)),
        ],
        out_specs=pl.BlockSpec((1, L), lambda i: (0, 0)),
        scratch_shapes=[pltpu.VMEM((9 * C, L), jnp.float32)],
        compiler_params=pltpu.CompilerParams(
            dimension_semantics=("arbitrary",),
            # Actual VMEM use is <1 MiB; keep the scoped limit small so the same
            # kernel stays well inside v7x's 64 MiB physical / 32 MiB scoped budget.
            vmem_limit_bytes=4 * 1024 * 1024),
        cost_estimate=pl.CostEstimate(
            flops=flops, transcendentals=C, bytes_accessed=bytes_accessed),
    )(fp, wm, aux)

    # TODO(synk): for large M (= N*H*W) tile the pixel axis across a grid dimension
    # with a two-phase BN (stats pass marked "parallel" + apply pass) so v7x's second
    # TensorCore is used; the single-block form is right at this size.

    # Un-pad: padded-flat -> (N, Hp, Wp) -> crop halo -> NCHW (N, 1, H, W).
    out = out_flat[0, :N * Hp * Wp].reshape(N, Hp, Wp)[:, 1:1 + H, 1:1 + W]
    return out[:, None, :, :]


def reference(x, w1, b1, gamma, beta, w2, b2):
    """Pure-JAX reference of the PyTorch forward (training-mode BN)."""
    xh = jnp.transpose(x, (0, 2, 3, 1))                              # NHWC
    w1_hwio = jnp.transpose(w1, (2, 3, 1, 0))
    y = jax.lax.conv_general_dilated(
        xh, w1_hwio, (1, 1), "SAME",
        dimension_numbers=("NHWC", "HWIO", "NHWC")) + b1.reshape(1, 1, 1, -1)
    mean = y.mean(axis=(0, 1, 2), keepdims=True)
    var = ((y - mean) ** 2).mean(axis=(0, 1, 2), keepdims=True)
    y = (y - mean) / jnp.sqrt(var + BN_EPS)
    y = y * gamma.reshape(1, 1, 1, -1) + beta.reshape(1, 1, 1, -1)
    y = jnp.maximum(y, 0.0)
    w2_hwio = jnp.transpose(w2, (2, 3, 1, 0))
    out = jax.lax.conv_general_dilated(
        y, w2_hwio, (1, 1), "VALID",
        dimension_numbers=("NHWC", "HWIO", "NHWC")) + b2.reshape(1, 1, 1, -1)
    return jnp.transpose(out, (0, 3, 1, 2))                          # NCHW


if __name__ == "__main__":
    N, C, H, W = 2, 8, 16, 16

    key = jax.random.PRNGKey(0)
    k_x, k_w1, k_b1, k_g, k_b, k_w2, k_b2 = jax.random.split(key, 7)

    x = jax.random.normal(k_x, (N, C, H, W), jnp.float32)
    w1 = 0.1 * jax.random.normal(k_w1, (C, C, 3, 3), jnp.float32)    # (C_out, C_in, kh, kw)
    b1 = 0.1 * jax.random.normal(k_b1, (C,), jnp.float32)
    gamma = 1.0 + 0.1 * jax.random.normal(k_g, (C,), jnp.float32)
    beta = 0.1 * jax.random.normal(k_b, (C,), jnp.float32)
    w2 = 0.1 * jax.random.normal(k_w2, (1, C, 1, 1), jnp.float32)    # (1, C_in, 1, 1)
    b2 = 0.1 * jax.random.normal(k_b2, (1,), jnp.float32)

    # Call-invariant repack done once at init time (not per forward call).
    wm, aux = make_prediction_head_params(w1, b1, gamma, beta, w2, b2,
                                          batch=N, height=H, width=W)

    out = jax.block_until_ready(prediction_head(x, wm, aux))
    ref = jax.block_until_ready(reference(x, w1, b1, gamma, beta, w2, b2))

    assert out.shape == (N, 1, H, W), out.shape
    np.testing.assert_allclose(np.asarray(out), np.asarray(ref), rtol=1e-3, atol=1e-3)
    print("KERNEL_OK")
</pallas_src>

<mosaic_0001>
module attributes {stable_mosaic.version = 11 : i64} {
  func.func @kernel(%arg0: i32, %arg1: memref<8x768xf32, #tpu.memory_space<vmem>>, %arg2: memref<9x768xf32, #tpu.memory_space<vmem>>, %arg3: memref<8x4xf32, #tpu.memory_space<vmem>>, %arg4: memref<1x768xf32, #tpu.memory_space<vmem>>, %arg5: memref<72x768xf32, #tpu.memory_space<vmem>>) attributes {dimension_semantics = [#tpu.dimension_semantics<arbitrary>], iteration_bounds = array<i64: 1>, scalar_prefetch = 0 : i64, scratch_operands = 1 : i64, tpu.core_type = #tpu.core_type<tc>, window_params = [{pipeline_mode = #tpu.pipeline_mode<synchronous>, transform_indices = @transform_0, window_bounds = array<i64: 8, 768>}, {pipeline_mode = #tpu.pipeline_mode<synchronous>, transform_indices = @transform_1, window_bounds = array<i64: 9, 768>}, {pipeline_mode = #tpu.pipeline_mode<synchronous>, transform_indices = @transform_2, window_bounds = array<i64: 8, 4>}, {pipeline_mode = #tpu.pipeline_mode<synchronous>, transform_indices = @transform_3, window_bounds = array<i64: 1, 768>}]} {
    %c0 = arith.constant 0 : index
    %c0_0 = arith.constant 0 : index
    %0 = vector.load %arg1[%c0, %c0_0] : memref<8x768xf32, #tpu.memory_space<vmem>>, vector<8x768xf32>
    %c19_i32 = arith.constant 19 : i32
    %1 = tpu.dynamic_rotate %0 by %c19_i32 dim 1 : vector<8x768xf32>, i32 -> vector<8x768xf32>
    %c0_1 = arith.constant 0 : index
    %c0_2 = arith.constant 0 : index
    %2 = vector.load %arg5[%c0_1, %c0_2] : memref<72x768xf32, #tpu.memory_space<vmem>>, vector<8x768xf32>
    tpu.vector_store %arg5[%c0_1, %c0_2], %1 {strides = array<i32>} : memref<72x768xf32, #tpu.memory_space<vmem>>, vector<8x768xf32>,
    %c18_i32 = arith.constant 18 : i32
    %3 = tpu.dynamic_rotate %0 by %c18_i32 dim 1 : vector<8x768xf32>, i32 -> vector<8x768xf32>
    %c8 = arith.constant 8 : index
    %c0_3 = arith.constant 0 : index
    %4 = vector.load %arg5[%c8, %c0_3] : memref<72x768xf32, #tpu.memory_space<vmem>>, vector<8x768xf32>
    tpu.vector_store %arg5[%c8, %c0_3], %3 {strides = array<i32>} : memref<72x768xf32, #tpu.memory_space<vmem>>, vector<8x768xf32>,
    %c17_i32 = arith.constant 17 : i32
    %5 = tpu.dynamic_rotate %0 by %c17_i32 dim 1 : vector<8x768xf32>, i32 -> vector<8x768xf32>
    %c16 = arith.constant 16 : index
    %c0_4 = arith.constant 0 : index
    %6 = vector.load %arg5[%c16, %c0_4] : memref<72x768xf32, #tpu.memory_space<vmem>>, vector<8x768xf32>
    tpu.vector_store %arg5[%c16, %c0_4], %5 {strides = array<i32>} : memref<72x768xf32, #tpu.memory_space<vmem>>, vector<8x768xf32>,
    %c1_i32 = arith.constant 1 : i32
    %7 = tpu.dynamic_rotate %0 by %c1_i32 dim 1 : vector<8x768xf32>, i32 -> vector<8x768xf32>
    %c24 = arith.constant 24 : index
    %c0_5 = arith.constant 0 : index
    %8 = vector.load %arg5[%c24, %c0_5] : memref<72x768xf32, #tpu.memory_space<vmem>>, vector<8x768xf32>
    tpu.vector_store %arg5[%c24, %c0_5], %7 {strides = array<i32>} : memref<72x768xf32, #tpu.memory_space<vmem>>, vector<8x768xf32>,
    %c32 = arith.constant 32 : index
    %c0_6 = arith.constant 0 : index
    %9 = vector.load %arg5[%c32, %c0_6] : memref<72x768xf32, #tpu.memory_space<vmem>>, vector<8x768xf32>
    tpu.vector_store %arg5[%c32, %c0_6], %0 {strides = array<i32>} : memref<72x768xf32, #tpu.memory_space<vmem>>, vector<8x768xf32>,
    %c767_i32 = arith.constant 767 : i32
    %10 = tpu.dynamic_rotate %0 by %c767_i32 dim 1 : vector<8x768xf32>, i32 -> vector<8x768xf32>
    %c40 = arith.constant 40 : index
    %c0_7 = arith.constant 0 : index
    %11 = vector.load %arg5[%c40, %c0_7] : memref<72x768xf32, #tpu.memory_space<vmem>>, vector<8x768xf32>
    tpu.vector_store %arg5[%c40, %c0_7], %10 {strides = array<i32>} : memref<72x768xf32, #tpu.memory_space<vmem>>, vector<8x768xf32>,
    %c751_i32 = arith.constant 751 : i32
    %12 = tpu.dynamic_rotate %0 by %c751_i32 dim 1 : vector<8x768xf32>, i32 -> vector<8x768xf32>
    %c48 = arith.constant 48 : index
    %c0_8 = arith.constant 0 : index
    %13 = vector.load %arg5[%c48, %c0_8] : memref<72x768xf32, #tpu.memory_space<vmem>>, vector<8x768xf32>
    tpu.vector_store %arg5[%c48, %c0_8], %12 {strides = array<i32>} : memref<72x768xf32, #tpu.memory_space<vmem>>, vector<8x768xf32>,
    %c750_i32 = arith.constant 750 : i32
    %14 = tpu.dynamic_rotate %0 by %c750_i32 dim 1 : vector<8x768xf32>, i32 -> vector<8x768xf32>
    %c56 = arith.constant 56 : index
    %c0_9 = arith.constant 0 : index
    %15 = vector.load %arg5[%c56, %c0_9] : memref<72x768xf32, #tpu.memory_space<vmem>>, vector<8x768xf32>
    tpu.vector_store %arg5[%c56, %c0_9], %14 {strides = array<i32>} : memref<72x768xf32, #tpu.memory_space<vmem>>, vector<8x768xf32>,
    %c749_i32 = arith.constant 749 : i32
    %16 = tpu.dynamic_rotate %0 by %c749_i32 dim 1 : vector<8x768xf32>, i32 -> vector<8x768xf32>
    %c64 = arith.constant 64 : index
    %c0_10 = arith.constant 0 : index
    %17 = vector.load %arg5[%c64, %c0_10] : memref<72x768xf32, #tpu.memory_space<vmem>>, vector<8x768xf32>
    tpu.vector_store %arg5[%c64, %c0_10], %16 {strides = array<i32>} : memref<72x768xf32, #tpu.memory_space<vmem>>, vector<8x768xf32>,
    %c0_11 = arith.constant 0 : index
    %c0_12 = arith.constant 0 : index
    %18 = vector.load %arg2[%c0_11, %c0_12] : memref<9x768xf32, #tpu.memory_space<vmem>>, vector<8x72xf32>
    %c0_13 = arith.constant 0 : index
    %c0_14 = arith.constant 0 : index
    %19 = vector.load %arg5[%c0_13, %c0_14] : memref<72x768xf32, #tpu.memory_space<vmem>>, vector<72x768xf32>
    %cst = arith.constant dense<0.000000e+00> : vector<8x768xf32>
    %20 = tpu.matmul %18, %19, %cst {dimension_numbers = #tpu.dot_dimension_numbers<[1], [0], [0], [1], [0, 0, 1, 1], [], []>} : vector<8x72xf32>, vector<72x768xf32>, vector<8x768xf32> -> vector<8x768xf32>
    %c8_15 = arith.constant 8 : index
    %c0_16 = arith.constant 0 : index
    %21 = vector.load %arg2[%c8_15, %c0_16] : memref<9x768xf32, #tpu.memory_space<vmem>>, vector<1x768xf32>
    %22 = vector.broadcast %21 : vector<1x768xf32> to vector<8x768xf32>
    %23 = arith.mulf %20, %22 : vector<8x768xf32>
    %cst_17 = arith.constant dense<0.000000e+00> : vector<8xf32>
    %24 = vector.multi_reduction <add>, %23, %cst_17 [1] : vector<8x768xf32> to vector<8xf32>
    %25 = vector.shape_cast %24 : vector<8xf32> to vector<8x1xf32>
    %cst_18 = arith.constant 0.001953125 : f32
    %26 = vector.broadcast %cst_18 : f32 to vector<8x1xf32>
    %27 = arith.mulf %25, %26 : vector<8x1xf32>
    %28 = vector.broadcast %27 : vector<8x1xf32> to vector<8x768xf32>
    %29 = arith.subf %20, %28 : vector<8x768xf32>
    %30 = vector.broadcast %21 : vector<1x768xf32> to vector<8x768xf32>
    %31 = arith.mulf %29, %30 : vector<8x768xf32>
    %32 = arith.mulf %31, %31 : vector<8x768xf32>
    %cst_19 = arith.constant dense<0.000000e+00> : vector<8xf32>
    %33 = vector.multi_reduction <add>, %32, %cst_19 [1] : vector<8x768xf32> to vector<8xf32>
    %34 = vector.shape_cast %33 : vector<8xf32> to vector<8x1xf32>
    %cst_20 = arith.constant 0.001953125 : f32
    %35 = vector.broadcast %cst_20 : f32 to vector<8x1xf32>
    %36 = arith.mulf %34, %35 : vector<8x1xf32>
    %c0_21 = arith.constant 0 : index
    %c0_22 = arith.constant 0 : index
    %37 = vector.load %arg3[%c0_21, %c0_22] : memref<8x4xf32, #tpu.memory_space<vmem>>, vector<8x1xf32>
    %c0_23 = arith.constant 0 : index
    %c1 = arith.constant 1 : index
    %38 = vector.load %arg3[%c0_23, %c1] : memref<8x4xf32, #tpu.memory_space<vmem>>, vector<8x1xf32>
    %cst_24 = arith.constant 9.99999974E-6 : f32
    %39 = vector.broadcast %cst_24 : f32 to vector<8x1xf32>
    %40 = arith.addf %36, %39 : vector<8x1xf32>
    %41 = math.rsqrt %40 : vector<8x1xf32>
    %42 = arith.mulf %37, %41 : vector<8x1xf32>
    %43 = arith.mulf %27, %42 : vector<8x1xf32>
    %44 = arith.subf %38, %43 : vector<8x1xf32>
    %45 = vector.broadcast %42 : vector<8x1xf32> to vector<8x768xf32>
    %46 = arith.mulf %20, %45 : vector<8x768xf32>
    %47 = vector.broadcast %44 : vector<8x1xf32> to vector<8x768xf32>
    %48 = arith.addf %46, %47 : vector<8x768xf32>
    %cst_25 = arith.constant 0.000000e+00 : f32
    %49 = vector.broadcast %cst_25 : f32 to vector<8x768xf32>
    %50 = arith.maximumf %48, %49 : vector<8x768xf32>
    %c0_26 = arith.constant 0 : index
    %c2 = arith.constant 2 : index
    %51 = vector.load %arg3[%c0_26, %c2] : memref<8x4xf32, #tpu.memory_space<vmem>>, vector<8x1xf32>
    %c0_27 = arith.constant 0 : index
    %c3 = arith.constant 3 : index
    %52 = vector.load %arg3[%c0_27, %c3] : memref<8x4xf32, #tpu.memory_space<vmem>>, vector<1x1xf32>
    %53 = vector.broadcast %51 : vector<8x1xf32> to vector<8x768xf32>
    %54 = arith.mulf %50, %53 : vector<8x768xf32>
    %cst_28 = arith.constant dense<0.000000e+00> : vector<768xf32>
    %55 = vector.multi_reduction <add>, %54, %cst_28 [0] : vector<8x768xf32> to vector<768xf32>
    %56 = vector.shape_cast %55 : vector<768xf32> to vector<1x768xf32>
    %57 = vector.broadcast %52 : vector<1x1xf32> to vector<1x768xf32>
    %58 = arith.addf %56, %57 : vector<1x768xf32>
    %c0_29 = arith.constant 0 : index
    %c0_30 = arith.constant 0 : index
    %59 = vector.load %arg4[%c0_29, %c0_30] : memref<1x768xf32, #tpu.memory_space<vmem>>, vector<1x768xf32>
    tpu.vector_store %arg4[%c0_29, %c0_30], %58 {strides = array<i32>} : memref<1x768xf32, #tpu.memory_space<vmem>>, vector<1x768xf32>,
    return
  }
  func.func @transform_0(%arg0: i32) -> (i32, i32) {
    %c0_i32 = arith.constant 0 : i32
    %c0_i32_0 = arith.constant 0 : i32
    %c0_i32_1 = arith.constant 0 : i32
    return %c0_i32, %c0_i32_0 : i32, i32
  }
  func.func @transform_1(%arg0: i32) -> (i32, i32) {
    %c0_i32 = arith.constant 0 : i32
    %c0_i32_0 = arith.constant 0 : i32
    %c0_i32_1 = arith.constant 0 : i32
    return %c0_i32, %c0_i32_0 : i32, i32
  }
  func.func @transform_2(%arg0: i32) -> (i32, i32) {
    %c0_i32 = arith.constant 0 : i32
    %c0_i32_0 = arith.constant 0 : i32
    %c0_i32_1 = arith.constant 0 : i32
    return %c0_i32, %c0_i32_0 : i32, i32
  }
  func.func @transform_3(%arg0: i32) -> (i32, i32) {
    %c0_i32 = arith.constant 0 : i32
    %c0_i32_0 = arith.constant 0 : i32
    %c0_i32_1 = arith.constant 0 : i32
    return %c0_i32, %c0_i32_0 : i32, i32
  }
}

</mosaic_0001>

<bundles_post_ra>
// kernel: squeeze.1
= control target key start
LH: loop header
LB: loop body
LE: loop exit
PB: predicated region body
PF: predicated region fallthrough
CT: control target
= control target key end

     0   :  { %s386_s10 = smov 118   ;;  %s387_s11 = smov 114   ;;  %vm213_vm0 = vcmask 965632   ;;  %vm227_vm1 = vcmask 982016   ;;  %vm241_vm2 = vcmask 998400   ;;  %vm255_vm3 = vcmask 1014784   ;;  %s708_s0 = inlined_call_operand.vmem [shape: f32[648], index: 0, kind: input, shape index: {}]   ;;  %s709_s1 = inlined_call_operand.vmem [shape: f32[2,18,18], index: 1, kind: output, shape index: {}]  }
   0x1   :  { %v278_v0 = vld [vmem:[%s708_s0 + $0x4] sm:$0x1]   ;;  %v282_v1 = vld [vmem:[%s708_s0 + $0x2] sm:$0x1]   ;;  %v280_v2 = vld [vmem:[%s708_s0 + $0x3] sm:$0x1]  }
   0x2   :  { %7 = vrot.lane.b32.xlu0 %v278_v0, %s386_s10  ;;  %21 = vrot.lane.b32.xlu1 %v282_v1, %s387_s11  ;;  %v284_v3 = vld [vmem:[%s708_s0 + $0x1] sm:$0x1]   ;;  %s388_s16 = smov 116   ;;  %s389_s17 = smov 112   ;;  %v33_v4 = vld [vmem:[%s708_s0] sm:$0x1]  }
   0x3   :  { %v287_v5 = vld [vmem:[%s708_s0 + $0x4] sm:$0x1]   ;;  %v333_v7 = vld [vmem:[%s708_s0 + $0x5] sm:$0x1]   ;;  %v336_v8 = vld [vmem:[%s708_s0 + $0x3] sm:$0x1]  }
   0x4   :  { %v332_v6 = vld [vmem:[%s708_s0 + $0x4] sm:$0x1]   ;;  %s390_s30 = smov 110   ;;  %s391_s2 = smov 100   ;;  %v340_v12 = vld [vmem:[%s708_s0 + $0x2] sm:$0x1]  }
   0x5   :  { %v337_v9 = vld [vmem:[%s708_s0 + $0x4] sm:$0x1]   ;;  %v214_v10 = vsel %vm213_vm0, %v333_v7, %v332_v6  ;;  %v341_v13 = vld [vmem:[%s708_s0 + $0x3] sm:$0x1]   ;;  %v344_v14 = vld [vmem:[%s708_s0 + $0x1] sm:$0x1]  }
   0x6   :  { %14 = vrot.lane.b32.xlu0 %v280_v2, %s388_s16  ;;  %28 = vrot.lane.b32.xlu1 %v284_v3, %s389_s17  ;;  %v228_v11 = vsel %vm227_vm1, %v337_v9, %v336_v8  ;;  %v345_v15 = vld [vmem:[%s708_s0 + $0x2] sm:$0x1]   ;;  %s392_s11 = smov 10   ;;  %s393_s12 = smov 8   ;;  %v242_v16 = vsel %vm241_vm2, %v341_v13, %v340_v12  ;;  %v265_v18 = vld [vmem:[%s708_s0] sm:$0x1]  }
   0x7   :  { %v256_v17 = vsel %vm255_vm3, %v345_v15, %v344_v14  ;;  %v348_v19 = vld [vmem:[%s708_s0 + $0x1] sm:$0x1]   ;;  %vm268_vm4 = vcmask 1031168   ;;  %s394_s17 = smov 6   ;;  %s395_s18 = smov 4   ;;  %vm3_vm5 = vcmask 146432  }
   0x8   :  { %v269_v20 = vsel %vm268_vm4, %v348_v19, %v265_v18  ;;  %v289_v21 = vld [vmem:[%s708_s0 + $0x3] sm:$0x1]   ;;  %s396_s21 = smov 2   ;;  %s397_s22 = smov 98   ;;  %v291_v22 = vld [vmem:[%s708_s0 + $0x2] sm:$0x1]  }
   0x9   :  { %v293_v23 = vld [vmem:[%s708_s0 + $0x1] sm:$0x1]   ;;  %s398_s27 = smov 96   ;;  %s399_s28 = smov 94   ;;  %v67_v24 = vld [vmem:[%s708_s0] sm:$0x1]  }
   0xa   :  { %34 = vrot.lane.b32.xlu0 %v33_v4, %s390_s30  ;;  %41 = vrot.lane.b32.xlu1 %v287_v5, %s391_s2  ;;  %v296_v25 = vld [vmem:[%s708_s0 + $0x4] sm:$0x1]   ;;  %s400_s4 = smov 92   ;;  %s401_s5 = smov 82   ;;  %v298_v26 = vld [vmem:[%s708_s0 + $0x3] sm:$0x1]  }
   0xb   :  { %v300_v27 = vld [vmem:[%s708_s0 + $0x2] sm:$0x1]   ;;  %s402_s10 = smov 80   ;;  %v302_v28 = vld [vmem:[%s708_s0 + $0x1] sm:$0x1]   ;;  %s404_s16 = smov 76  }
   0xc   :  { %v101_v29 = vld [vmem:[%s708_s0] sm:$0x1]   ;;  %v305_v30 = vld [vmem:[%s708_s0 + $0x4] sm:$0x1]   ;;  %v307_v31 = vld [vmem:[%s708_s0 + $0x3] sm:$0x1]  }
   0xd   :  { %s407_s23 = smov 62   ;;  %v309_v32 = vld [vmem:[%s708_s0 + $0x2] sm:$0x1]   ;;  %v311_v33 = vld [vmem:[%s708_s0 + $0x1] sm:$0x1]   ;;  %s409_s29 = smov 58  }
   0xe   :  { %215 = vrot.lane.b32.xlu0 %v214_v10, %s392_s11  ;;  %229 = vrot.lane.b32.xlu1 %v228_v11, %s393_s12  ;;  %s403_s11 = smov 78   ;;  %v135_v34 = vld [vmem:[%s708_s0] sm:$0x1]   ;;  %v314_v35 = vld [vmem:[%s708_s0 + $0x4] sm:$0x1]   ;;  %s411_s6 = smov 46  }
   0xf   :  { %v316_v36 = vld [vmem:[%s708_s0 + $0x3] sm:$0x1]   ;;  %v318_v37 = vld [vmem:[%s708_s0 + $0x2] sm:$0x1]   ;;  %s413_s12 = smov 42   ;;  %vm217_vm6 = vcmask 80896  }
  0x10   :  { %v320_v38 = vld [vmem:[%s708_s0 + $0x1] sm:$0x1]   ;;  %v169_v39 = vld [vmem:[%s708_s0] sm:$0x1]   ;;  %v323_v41 = vld [vmem:[%s708_s0 + $0x4] sm:$0x1]  }
  0x11   :  { %v2_v40 = vld [vmem:[%s708_s0] sm:$0x1]   ;;  %v325_v42 = vld [vmem:[%s708_s0 + $0x3] sm:$0x1]   ;;  %v327_v43 = vld [vmem:[%s708_s0 + $0x2] sm:$0x1]  }
  0x12   :  { %243 = vrot.lane.b32.xlu0 %v242_v16, %s394_s17  ;;  %257 = vrot.lane.b32.xlu1 %v256_v17, %s395_s18  ;;  %s405_s17 = smov 74   ;;  %4 = vst.msk [vmem:[%s709_s1] sm:$0x1] %vm3_vm5, %v2_v40   ;;  %v329_v44 = vld [vmem:[%s708_s0 + $0x1] sm:$0x1]   ;;  %vm231_vm7 = vcmask 64512  }
  0x13   :  { %v203_v45 = vld [vmem:[%s708_s0] sm:$0x1]   ;;  %s420_s0 = smov 20   ;;  %vm220_vm8 = vcmask 146512   ;;  %vm234_vm9 = vcmask 146496   ;;  %vm245_vm10 = vcmask 48128  }
  0x14   :  { %vm259_vm11 = vcmask 31744   ;;  %vm248_vm12 = vcmask 146480   ;;  %vm262_vm13 = vcmask 146464   ;;  %vm272_vm14 = vcmask 15360  }
  0x15   :  { %vm275_vm15 = vcmask 146448  }
  0x16   :  { %270 = vrot.lane.b32.xlu0 %v269_v20, %s396_s21  ;;  %48 = vrot.lane.b32.xlu1 %v289_v21, %s397_s22  ;;  %s406_s22 = smov 64   ;;  %s414_s21 = smov 40  }
  0x1a   :  { %55 = vrot.lane.b32.xlu0 %v291_v22, %s398_s27  ;;  %62 = vrot.lane.b32.xlu1 %v293_v23, %s399_s28  ;;  %s408_s28 = smov 60   ;;  %s416_s27 = smov 28  }
  0x1e   :  { %68 = vrot.lane.b32.xlu0 %v67_v24, %s400_s4  ;;  %75 = vrot.lane.b32.xlu1 %v296_v25, %s401_s5  ;;  %s410_s5 = smov 56   ;;  %s418_s4 = smov 24  }
  0x22   :  { %82 = vrot.lane.b32.xlu0 %v298_v26, %s402_s10  ;;  %89 = vrot.lane.b32.xlu1 %v300_v27, %s403_s11  ;;  %s412_s11 = smov 44  }
  0x26   :  { %96 = vrot.lane.b32.xlu0 %v302_v28, %s404_s16  ;;  %102 = vrot.lane.b32.xlu1 %v101_v29, %s405_s17 }
  0x2a   :  { %109 = vrot.lane.b32.xlu0 %v305_v30, %s406_s22  ;;  %116 = vrot.lane.b32.xlu1 %v307_v31, %s407_s23  ;;  %s415_s22 = smov 38  }
  0x2e   :  { %123 = vrot.lane.b32.xlu0 %v309_v32, %s408_s28  ;;  %130 = vrot.lane.b32.xlu1 %v311_v33, %s409_s29  ;;  %s417_s28 = smov 26  }
  0x32   :  { %136 = vrot.lane.b32.xlu0 %v135_v34, %s410_s5  ;;  %143 = vrot.lane.b32.xlu1 %v314_v35, %s411_s6  ;;  %s419_s5 = smov 22  }
  0x36   :  { %150 = vrot.lane.b32.xlu0 %v316_v36, %s412_s11  ;;  %157 = vrot.lane.b32.xlu1 %v318_v37, %s413_s12 }
  0x3a   :  { %164 = vrot.lane.b32.xlu0 %v320_v38, %s414_s21  ;;  %170 = vrot.lane.b32.xlu1 %v169_v39, %s415_s22 }
  0x3e   :  { %177 = vrot.lane.b32.xlu0 %v323_v41, %s416_s27  ;;  %184 = vrot.lane.b32.xlu1 %v325_v42, %s417_s28 }
  0x42   :  { %191 = vrot.lane.b32.xlu0 %v327_v43, %s418_s4  ;;  %198 = vrot.lane.b32.xlu1 %v329_v44, %s419_s5 }
  0x46   :  { %204 = vrot.lane.b32.xlu0 %v203_v45, %s420_s0 }
  0x74   :  { %v8_v46 = vpop.permute.xlu0 %7   ;;  %v22_v47 = vpop.permute.xlu1 %21  }
  0x75   :  { %279 = vst.msk [vmem:[%s709_s1 + $0x23] sm:$0x1] %vm3_vm5, %v8_v46   ;;  %283 = vst.msk [vmem:[%s709_s1 + $0xf] sm:$0x1] %vm3_vm5, %v22_v47  }
  0x78   :  { %v15_v48 = vpop.permute.xlu0 %14   ;;  %v29_v49 = vpop.permute.xlu1 %28  }
  0x79   :  { %281 = vst.msk [vmem:[%s709_s1 + $0x1c] sm:$0x1] %vm3_vm5, %v15_v48   ;;  %285 = vst.msk [vmem:[%s709_s1 + $0x8] sm:$0x1] %vm3_vm5, %v29_v49  }
  0x7c   :  { %v35_v50 = vpop.permute.xlu0 %34   ;;  %v42_v51 = vpop.permute.xlu1 %41  }
  0x7d   :  { %286 = vst.msk [vmem:[%s709_s1 + $0x1] sm:$0x1] %vm3_vm5, %v35_v50   ;;  %288 = vst.msk [vmem:[%s709_s1 + $0x24] sm:$0x1] %vm3_vm5, %v42_v51  }
  0x80   :  { %v216_v52 = vpop.permute.xlu0 %215   ;;  %v230_v53 = vpop.permute.xlu1 %229  }
  0x81   :  { %334 = vst.msk [vmem:[%s709_s1 + $0x29] sm:$0x1] %vm217_vm6, %v216_v52  }
  0x82   :  { %338 = vst.msk [vmem:[%s709_s1 + $0x22] sm:$0x1] %vm231_vm7, %v230_v53  }
  0x83   :  { %335 = vst.msk [vmem:[%s709_s1 + $0x29] sm:$0x1] %vm220_vm8, %v216_v52  }
  0x84   :  { %339 = vst.msk [vmem:[%s709_s1 + $0x22] sm:$0x1] %vm234_vm9, %v230_v53   ;;  %v244_v54 = vpop.permute.xlu0 %243   ;;  %v258_v55 = vpop.permute.xlu1 %257  }
  0x85   :  { %342 = vst.msk [vmem:[%s709_s1 + $0x1b] sm:$0x1] %vm245_vm10, %v244_v54  }
  0x86   :  { %346 = vst.msk [vmem:[%s709_s1 + $0xe] sm:$0x1] %vm259_vm11, %v258_v55  }
  0x87   :  { %343 = vst.msk [vmem:[%s709_s1 + $0x1b] sm:$0x1] %vm248_vm12, %v244_v54  }
  0x88   :  { %347 = vst.msk [vmem:[%s709_s1 + $0xe] sm:$0x1] %vm262_vm13, %v258_v55   ;;  %v271_v56 = vpop.permute.xlu0 %270   ;;  %v49_v57 = vpop.permute.xlu1 %48  }
  0x89   :  { %349 = vst.msk [vmem:[%s709_s1 + $0x7] sm:$0x1] %vm272_vm14, %v271_v56  }
  0x8a   :  { %290 = vst.msk [vmem:[%s709_s1 + $0x1d] sm:$0x1] %vm3_vm5, %v49_v57  }
  0x8b   :  { %350 = vst.msk [vmem:[%s709_s1 + $0x7] sm:$0x1] %vm275_vm15, %v271_v56  }
  0x8c   :  { %v56_v58 = vpop.permute.xlu0 %55   ;;  %v63_v59 = vpop.permute.xlu1 %62  }
  0x8d   :  { %292 = vst.msk [vmem:[%s709_s1 + $0x10] sm:$0x1] %vm3_vm5, %v56_v58   ;;  %294 = vst.msk [vmem:[%s709_s1 + $0x9] sm:$0x1] %vm3_vm5, %v63_v59  }
  0x90   :  { %v69_v60 = vpop.permute.xlu0 %68   ;;  %v76_v61 = vpop.permute.xlu1 %75  }
  0x91   :  { %295 = vst.msk [vmem:[%s709_s1 + $0x2] sm:$0x1] %vm3_vm5, %v69_v60   ;;  %297 = vst.msk [vmem:[%s709_s1 + $0x25] sm:$0x1] %vm3_vm5, %v76_v61  }
  0x94   :  { %v83_v62 = vpop.permute.xlu0 %82   ;;  %v90_v63 = vpop.permute.xlu1 %89  }
  0x95   :  { %299 = vst.msk [vmem:[%s709_s1 + $0x1e] sm:$0x1] %vm3_vm5, %v83_v62   ;;  %301 = vst.msk [vmem:[%s709_s1 + $0x11] sm:$0x1] %vm3_vm5, %v90_v63  }
  0x98   :  { %v97_v0 = vpop.permute.xlu0 %96   ;;  %v103_v1 = vpop.permute.xlu1 %102  }
  0x99   :  { %303 = vst.msk [vmem:[%s709_s1 + $0xa] sm:$0x1] %vm3_vm5, %v97_v0   ;;  %304 = vst.msk [vmem:[%s709_s1 + $0x3] sm:$0x1] %vm3_vm5, %v103_v1  }
  0x9c   :  { %v110_v2 = vpop.permute.xlu0 %109   ;;  %v117_v3 = vpop.permute.xlu1 %116  }
  0x9d   :  { %306 = vst.msk [vmem:[%s709_s1 + $0x26] sm:$0x1] %vm3_vm5, %v110_v2   ;;  %308 = vst.msk [vmem:[%s709_s1 + $0x1f] sm:$0x1] %vm3_vm5, %v117_v3  }
  0xa0   :  { %v124_v4 = vpop.permute.xlu0 %123   ;;  %v131_v5 = vpop.permute.xlu1 %130  }
  0xa1   :  { %310 = vst.msk [vmem:[%s709_s1 + $0x18] sm:$0x1] %vm3_vm5, %v124_v4   ;;  %312 = vst.msk [vmem:[%s709_s1 + $0xb] sm:$0x1] %vm3_vm5, %v131_v5  }
  0xa4   :  { %v137_v6 = vpop.permute.xlu0 %136   ;;  %v144_v7 = vpop.permute.xlu1 %143  }
  0xa5   :  { %313 = vst.msk [vmem:[%s709_s1 + $0x4] sm:$0x1] %vm3_vm5, %v137_v6   ;;  %315 = vst.msk [vmem:[%s709_s1 + $0x27] sm:$0x1] %vm3_vm5, %v144_v7  }
  0xa8   :  { %v151_v8 = vpop.permute.xlu0 %150   ;;  %v158_v9 = vpop.permute.xlu1 %157  }
  0xa9   :  { %317 = vst.msk [vmem:[%s709_s1 + $0x20] sm:$0x1] %vm3_vm5, %v151_v8   ;;  %319 = vst.msk [vmem:[%s709_s1 + $0x19] sm:$0x1] %vm3_vm5, %v158_v9  }
  0xac   :  { %v165_v10 = vpop.permute.xlu0 %164   ;;  %v171_v11 = vpop.permute.xlu1 %170  }
  0xad   :  { %321 = vst.msk [vmem:[%s709_s1 + $0xc] sm:$0x1] %vm3_vm5, %v165_v10   ;;  %322 = vst.msk [vmem:[%s709_s1 + $0x5] sm:$0x1] %vm3_vm5, %v171_v11  }
  0xb0   :  { %v178_v12 = vpop.permute.xlu0 %177   ;;  %v185_v13 = vpop.permute.xlu1 %184  }
  0xb1   :  { %324 = vst.msk [vmem:[%s709_s1 + $0x28] sm:$0x1] %vm3_vm5, %v178_v12   ;;  %326 = vst.msk [vmem:[%s709_s1 + $0x21] sm:$0x1] %vm3_vm5, %v185_v13  }
  0xb4   :  { %v192_v14 = vpop.permute.xlu0 %191   ;;  %v199_v15 = vpop.permute.xlu1 %198  }
  0xb5   :  { %328 = vst.msk [vmem:[%s709_s1 + $0x1a] sm:$0x1] %vm3_vm5, %v192_v14   ;;  %330 = vst.msk [vmem:[%s709_s1 + $0xd] sm:$0x1] %vm3_vm5, %v199_v15  }
  0xb8   :  { %v205_v16 = vpop.permute.xlu0 %204  }
  0xb9   :  { %331 = vst.msk [vmem:[%s709_s1 + $0x6] sm:$0x1] %vm3_vm5, %v205_v16  }

// kernel: prediction_head.1
= control target key start
LH: loop header
LB: loop body
LE: loop exit
PB: predicated region body
PF: predicated region fallthrough
CT: control target
= control target key end

     0   :  { %s892_s20 = smov 19   ;;  %s893_s21 = smov 18   ;;  %v899_v10 = vmov 0.0   ;;  %v32_v11 = vlaneseq  ;;  %vm283_vm8 = vcmask 588800   ;;  %s1267_s0 = inlined_call_operand.vmem [shape: f32[8,768], index: 0, kind: input, shape index: {}]   ;;  %s1268_s1 = inlined_call_operand.vmem [shape: f32[9,768], index: 1, kind: input, shape index: {}]   ;;  %s1269_s2 = inlined_call_operand.vmem [shape: f32[8,4], index: 2, kind: input, shape index: {}]   ;;  %s1270_s3 = inlined_call_operand.vmem [shape: f32[1,768], index: 3, kind: output, shape index: {}]  }
   0x1   :  { %v929_v0 = vld [vmem:[%s1267_s0 + $0x10] sm:$0xff]  ;;  %v934_v1 = vld [vmem:[%s1267_s0 + $0x28] sm:$0xff]  ;;  %v939_v2 = vld [vmem:[%s1267_s0] sm:$0xff]  ;;  %s894_s22 = smov 1   ;;  %s895_s23 = smov 17   ;;  %351 = vmatprep.mubr.f32.mxu0 %v899_v10  ;;  %422 = vmatprep.mubr.f32.mxu1 %v899_v10 }
   0x2   :  { %v805_v3 = vpack.i.bf16 %v929_v0, %v934_v1  ;;  %v946_v4 = vld [vmem:[%s1267_s0 + $0x8] sm:$0xff]  ;;  %s896_s24 = smov 127   ;;  %s897_s25 = smov 110   ;;  %v958_v7 = vld [vmem:[%s1267_s0 + $0x18] sm:$0xff]  ;;  %v963_v8 = vld [vmem:[%s1267_s0 + $0x20] sm:$0xff]  ;;  %v986_v14 = vand.u32 127, %v32_v11 }
   0x3   :  { %v795_v5 = vpack.i.bf16 %v946_v4, %v939_v2  ;;  %v835_v6 = vpack.i.bf16 %v929_v0, %v946_v4  ;;  %s898_s26 = smov 111   ;;  %v855_v9 = vpack.i.bf16 %v963_v8, %v958_v7  ;;  %s900_s4 = smov 109   ;;  %vm721_vm9 = vcmp.lt.s32.totalorder %v32_v11, 768 }
   0x4   :  { %806 = vrot.lane.b32.xlu1 %v805_v3, %s892_s20  ;;  %vm34_vm0 = vcmp.lt.s32.totalorder %v986_v14, 19  ;;  %vm59_vm1 = vcmp.lt.s32.totalorder %v986_v14, 18  ;;  %vm84_vm2 = vcmp.lt.s32.totalorder %v986_v14, 17  ;;  %vm109_vm3 = vcmp.lt.s32.totalorder %v986_v14, 1 }
   0x5   :  { %796 = vrot.lane.b32.xlu0 %v795_v5, %s892_s20  ;;  %vm140_vm4 = vcmp.lt.s32.totalorder %v986_v14, 127  ;;  %vm190_vm5 = vcmp.lt.s32.totalorder %v986_v14, 110  ;;  %vm165_vm6 = vcmp.lt.s32.totalorder %v986_v14, 111  ;;  %vm215_vm7 = vcmp.lt.s32.totalorder %v986_v14, 109 }
   0x8   :  { %811 = vrot.lane.b32.xlu1 %v805_v3, %s893_s21 }
   0x9   :  { %801 = vrot.lane.b32.xlu0 %v795_v5, %s893_s21 }
   0xc   :  { %821 = vrot.lane.b32.xlu1 %v795_v5, %s894_s22 }
   0xd   :  { %816 = vrot.lane.b32.xlu0 %v795_v5, %s895_s23 }
  0x10   :  { %831 = vrot.lane.b32.xlu1 %v805_v3, %s894_s22 }
  0x11   :  { %826 = vrot.lane.b32.xlu0 %v805_v3, %s895_s23 }
  0x14   :  { %128 = vrot.lane.b32.xlu1 %v939_v2, %s896_s24 }
  0x15   :  { %836 = vrot.lane.b32.xlu0 %v835_v6, %s896_s24 }
  0x18   :  { %846 = vrot.lane.b32.xlu1 %v835_v6, %s897_s25 }
  0x19   :  { %841 = vrot.lane.b32.xlu0 %v835_v6, %s898_s26 }
  0x1c   :  { %178 = vrot.lane.b32.xlu1 %v939_v2, %s897_s25 }
  0x1d   :  { %153 = vrot.lane.b32.xlu0 %v939_v2, %s898_s26 }
  0x20   :  { %856 = vrot.lane.b32.xlu1 %v855_v9, %s893_s21 }
  0x21   :  { %851 = vrot.lane.b32.xlu0 %v855_v9, %s892_s20 }
  0x24   :  { %866 = vrot.lane.b32.xlu1 %v855_v9, %s894_s22 }
  0x25   :  { %861 = vrot.lane.b32.xlu0 %v855_v9, %s895_s23 }
  0x28   :  { %207 = vrot.lane.b32.xlu1 %v929_v0, %s900_s4 }
  0x29   :  { %205 = vrot.lane.b32.xlu0 %v946_v4, %s900_s4 }
  0x2c   :  { %871 = vrot.lane.b32.xlu1 %v855_v9, %s896_s24 }
  0x2d   :  { %203 = vrot.lane.b32.xlu0 %v939_v2, %s900_s4 }
  0x30   :  { %876 = vrot.lane.b32.xlu1 %v855_v9, %s898_s26 }
  0x31   :  { %138 = vrot.lane.b32.xlu0 %v934_v1, %s896_s24 }
  0x34   :  { %163 = vrot.lane.b32.xlu1 %v934_v1, %s898_s26 }
  0x35   :  { %881 = vrot.lane.b32.xlu0 %v855_v9, %s897_s25 }
  0x38   :  { %209 = vrot.lane.b32.xlu1 %v958_v7, %s900_s4 }
  0x39   :  { %188 = vrot.lane.b32.xlu0 %v934_v1, %s897_s25 }
  0x3c   :  { %213 = vrot.lane.b32.xlu1 %v934_v1, %s900_s4 }
  0x3d   :  { %211 = vrot.lane.b32.xlu0 %v963_v8, %s900_s4 }
  0x76   :  { %v981_v12 = vpop.permute.xlu1 %806 }
  0x77   :  { %v983_v13 = vpop.permute.xlu0 %796  ;;  %v808_v15 = vunpack.i.l.bf16 %v981_v12  ;;  %v809_v9 = vunpack.i.h.bf16 %v981_v12 }
  0x78   :  { %v799_v16 = vunpack.i.h.bf16 %v983_v13  ;;  %v798_v17 = vunpack.i.l.bf16 %v983_v13 }
  0x7a   :  { %v991_v18 = vpop.permute.xlu1 %811  ;;  %v39_v24 = vsel %vm34_vm0, %v798_v17, %v799_v16  ;;  %v40_v26 = vsel %vm34_vm0, %v808_v15, %v798_v17 }
  0x7b   :  { %v813_v19 = vunpack.i.l.bf16 %v991_v18  ;;  %v994_v20 = vpop.permute.xlu0 %801 }
  0x7c   :  { %v804_v21 = vunpack.i.h.bf16 %v994_v20  ;;  %v803_v22 = vunpack.i.l.bf16 %v994_v20 }
  0x7e   :  { %v1002_v23 = vpop.permute.xlu1 %821  ;;  %v64_v25 = vsel %vm59_vm1, %v803_v22, %v804_v21  ;;  %v65_v27 = vsel %vm59_vm1, %v813_v19, %v803_v22 }
  0x7f   :  { %v824_v28 = vunpack.i.h.bf16 %v1002_v23  ;;  %v823_v29 = vunpack.i.l.bf16 %v1002_v23  ;;  %v1022_v30 = vpop.permute.xlu0 %816  ;;  %v733_v31 = vpack.c.bf16 %v64_v25, %v39_v24  ;;  %v735_v32 = vpack.c.bf16 %v65_v27, %v40_v26 }
  0x80   :  { %v819_v33 = vunpack.i.h.bf16 %v1022_v30  ;;  %v818_v34 = vunpack.i.l.bf16 %v1022_v30 }
  0x81   :  { %734 = vmatprep.subr.bf16.mxu0 %v733_v31  ;;  %v114_v35 = vsel %vm109_vm3, %v823_v29, %v824_v28 }
  0x82   :  { %736 = vmatpush1.bf16.msra.mxu0 %v735_v32  ;;  %v1030_v36 = vpop.permute.xlu1 %831  ;;  %v89_v37 = vsel %vm84_vm2, %v818_v34, %v819_v33 }
  0x83   :  { %v833_v38 = vunpack.i.l.bf16 %v1030_v36  ;;  %v1037_v39 = vpop.permute.xlu0 %826  ;;  %v737_v40 = vpack.c.bf16 %v114_v35, %v89_v37  ;;  %v834_v25 = vunpack.i.h.bf16 %v1030_v36 }
  0x84   :  { %v828_v41 = vunpack.i.l.bf16 %v1037_v39  ;;  %v829_v26 = vunpack.i.h.bf16 %v1037_v39 }
  0x85   :  { %738 = vmatprep.subr.bf16.mxu0 %v737_v40  ;;  %v115_v42 = vsel %vm109_vm3, %v833_v38, %v823_v29  ;;  %v38_v40 = vsel %vm34_vm0, %v799_v16, %v809_v9  ;;  %v113_v13 = vsel %vm109_vm3, %v824_v28, %v834_v25 }
  0x86   :  { %v1044_v43 = vpop.permute.xlu1 %128  ;;  %v90_v44 = vsel %vm84_vm2, %v828_v41, %v818_v34 }
  0x87   :  { %v1050_v45 = vpop.permute.xlu0 %836  ;;  %v739_v46 = vpack.c.bf16 %v115_v42, %v90_v44 }
  0x88   :  { %v839_v47 = vunpack.i.h.bf16 %v1050_v45  ;;  %v838_v48 = vunpack.i.l.bf16 %v1050_v45 }
  0x89   :  { %740 = vmatpush1.bf16.msra.mxu0 %v739_v46 }
  0x8a   :  { %v1055_v49 = vpop.permute.xlu1 %846  ;;  %v144_v50 = vsel %vm140_vm4, %v838_v48, %v839_v47  ;;  %v145_v51 = vsel %vm140_vm4, %v1044_v43, %v838_v48  ;;  %v88_v48 = vsel %vm84_vm2, %v819_v33, %v829_v26 }
  0x8b   :  { %v849_v52 = vunpack.i.h.bf16 %v1055_v49  ;;  %v848_v53 = vunpack.i.l.bf16 %v1055_v49  ;;  %v1068_v54 = vpop.permute.xlu0 %841  ;;  %v741_v55 = vpack.c.bf16 %v144_v50, %v946_v4  ;;  %v743_v56 = vpack.c.bf16 %v145_v51, %v939_v2 }
  0x8c   :  { %v844_v57 = vunpack.i.h.bf16 %v1068_v54  ;;  %v843_v58 = vunpack.i.l.bf16 %v1068_v54  ;;  %v814_v4 = vunpack.i.h.bf16 %v991_v18  ;;  %v755_v33 = vpack.c.bf16 %v113_v13, %v88_v48 }
  0x8d   :  { %742 = vmatprep.subr.bf16.mxu0 %v741_v55  ;;  %v194_v59 = vsel %vm190_vm5, %v848_v53, %v849_v52 }
  0x8e   :  { %744 = vmatpush1.bf16.msra.mxu0 %v743_v56  ;;  %v1078_v60 = vpop.permute.xlu1 %178  ;;  %v169_v61 = vsel %vm165_vm6, %v843_v58, %v844_v57  ;;  %v63_v29 = vsel %vm59_vm1, %v804_v21, %v814_v4 }
  0x8f   :  { %v195_v62 = vsel %vm190_vm5, %v1078_v60, %v848_v53  ;;  %v1087_v63 = vpop.permute.xlu0 %153  ;;  %v745_v2 = vpack.c.bf16 %v194_v59, %v169_v61  ;;  %v751_v46 = vpack.c.bf16 %v63_v29, %v38_v40 }
  0x90   :  { %v170_v3 = vsel %vm165_vm6, %v1087_v63, %v843_v58 }
  0x91   :  { %v747_v5 = vpack.c.bf16 %v195_v62, %v170_v3  ;;  %746 = vmatprep.subr.bf16.mxu0 %v745_v2 }
  0x92   :  { %v857_v6 = vpop.permute.xlu1 %856 }
  0x93   :  { %v858_v17 = vunpack.i.l.bf16 %v857_v6  ;;  %v852_v22 = vpop.permute.xlu0 %851  ;;  %748 = vmatpush1.bf16.msra.mxu0 %v747_v5  ;;  %v859_v42 = vunpack.i.h.bf16 %v857_v6 }
  0x94   :  { %v853_v24 = vunpack.i.l.bf16 %v852_v22  ;;  %v854_v20 = vunpack.i.h.bf16 %v852_v22 }
  0x95   :  { %v62_v27 = vsel %vm59_vm1, %v814_v4, %v858_v17  ;;  %v61_v30 = vsel %vm59_vm1, %v858_v17, %v859_v42  ;;  %v60_v59 = vsel %vm59_vm1, %v859_v42, %v813_v19  ;;  %v1141_v4 = vld [vmem:[%s1268_s1] sm:$0xff] }
  0x96   :  { %v867_v31 = vpop.permute.xlu1 %866  ;;  %v37_v32 = vsel %vm34_vm0, %v809_v9, %v853_v24  ;;  %v36_v28 = vsel %vm34_vm0, %v853_v24, %v854_v20  ;;  %v35_v58 = vsel %vm34_vm0, %v854_v20, %v808_v15 }
  0x97   :  { %v868_v34 = vunpack.i.l.bf16 %v867_v31  ;;  %v862_v35 = vpop.permute.xlu0 %861  ;;  %v749_v37 = vpack.c.bf16 %v62_v27, %v37_v32  ;;  %v869_v51 = vunpack.i.h.bf16 %v867_v31  ;;  %v767_v18 = vpack.c.bf16 %v61_v30, %v36_v28 }
  0x98   :  { %v863_v44 = vunpack.i.l.bf16 %v862_v35  ;;  %v864_v53 = vunpack.i.h.bf16 %v862_v35  ;;  %v765_v5 = vpack.c.bf16 %v60_v59, %v35_v58 }
  0x99   :  { %750 = vmatprep.subr.bf16.mxu1 %v749_v37  ;;  %v112_v21 = vsel %vm109_vm3, %v834_v25, %v868_v34  ;;  %v110_v15 = vsel %vm109_vm3, %v869_v51, %v833_v38  ;;  %v111_v6 = vsel %vm109_vm3, %v868_v34, %v869_v51  ;;  %v731_v51 = vld [vmem:[%s1268_s1 + $0x30] ss:$8 sm:$0xf] }
  0x9a   :  { %752 = vmatpush1.bf16.msra.mxu1 %v751_v46  ;;  %v1119_v16 = vpop.permute.xlu1 %207  ;;  %v87_v50 = vsel %vm84_vm2, %v829_v26, %v863_v44  ;;  %v85_v12 = vsel %vm84_vm2, %v864_v53, %v828_v41  ;;  %v86_v9 = vsel %vm84_vm2, %v863_v44, %v864_v53 }
  0x9b   :  { %v206_v55 = vpop.permute.xlu0 %205  ;;  %v753_v56 = vpack.c.bf16 %v112_v21, %v87_v50  ;;  %v769_v41 = vpack.c.bf16 %v110_v15, %v85_v12  ;;  %v1211_v50 = vshrl.u32 %v32_v11, 7 }
  0x9c   :  { %v219_v23 = vsel %vm215_vm7, %v206_v55, %v1119_v16 }
  0x9d   :  { %303 = vmatprep.subr.mxu0 %v219_v23  ;;  %754 = vmatprep.subr.bf16.mxu1 %v753_v56  ;;  %v507_v53 = vsub.s32 0, %v1211_v50  ;;  %v527_v15 = vsub.s32 5, %v1211_v50 }
  0x9e   :  { %756 = vmatpush1.bf16.msra.mxu1 %v755_v33  ;;  %v872_v61 = vpop.permute.xlu1 %871 }
  0x9f   :  { %v874_v62 = vunpack.i.h.bf16 %v872_v61  ;;  %v873_v2 = vunpack.i.l.bf16 %v872_v61  ;;  %v204_v3 = vpop.permute.xlu0 %203  ;;  %v515_v61 = vsub.s32 2, %v1211_v50 }
  0xa0   :  { %v220_v19 = vsel %vm215_vm7, %v204_v3, %v206_v55  ;;  %v511_v55 = vsub.s32 1, %v1211_v50 }
  0xa1   :  { %304 = vmatpush1.msra.mxu0 %v220_v19  ;;  %v142_v39 = vsel %vm140_vm4, %v873_v2, %v874_v62  ;;  %v143_v36 = vsel %vm140_vm4, %v839_v47, %v873_v2  ;;  %v771_v47 = vpack.c.bf16 %v111_v6, %v86_v9  ;;  %v523_v2 = vsub.s32 4, %v1211_v50 }
  0xa2   :  { %766 = vmatprep.subr.bf16.mxu0 %v765_v5  ;;  %v877_v38 = vpop.permute.xlu1 %876  ;;  %728 = vmatmul.mubr.msk.f32.vlgmr.msra.gmra.mrb[0].mxu0 %vm283_vm8, %v1141_v4  ;;  %v757_v17 = vpack.c.bf16 %v142_v39, %v958_v7  ;;  %v759_v22 = vpack.c.bf16 %v143_v36, %v929_v0 }
  0xa3   :  { %v139_v24 = vpop.permute.xlu0 %138  ;;  %768 = vmatpush1.bf16.msra.mxu0 %v767_v18  ;;  %493 = vmatprep.mubr.f32.mxu0 %v899_v10  ;;  %v879_v25 = vunpack.i.h.bf16 %v877_v38  ;;  %v878_v27 = vunpack.i.l.bf16 %v877_v38 }
  0xa4   :  { %v146_v45 = vsel %vm140_vm4, %v139_v24, %v1044_v43  ;;  %770 = vmatprep.subr.bf16.mxu0 %v769_v41  ;;  %758 = vmatprep.subr.bf16.mxu1 %v757_v17  ;;  %v141_v7 = vsel %vm140_vm4, %v874_v62, %v139_v24  ;;  %v519_v62 = vsub.s32 3, %v1211_v50 }
  0xa5   :  { %v773_v26 = vpack.c.bf16 %v146_v45, %v934_v1  ;;  %760 = vmatpush1.bf16.msra.mxu1 %v759_v22  ;;  %v167_v32 = vsel %vm165_vm6, %v878_v27, %v879_v25  ;;  %v775_v43 = vpack.c.bf16 %v141_v7, %v963_v8  ;;  %v168_v35 = vsel %vm165_vm6, %v844_v57, %v878_v27 }
  0xa6   :  { %v164_v0 = vpop.permute.xlu1 %163 }
  0xa7   :  { %v882_v29 = vpop.permute.xlu0 %881  ;;  %772 = vmatpush1.bf16.msra.mxu0 %v771_v47  ;;  %v166_v8 = vsel %vm165_vm6, %v879_v25, %v164_v0  ;;  %v171_v46 = vsel %vm165_vm6, %v164_v0, %v1087_v63 }
  0xa8   :  { %v884_v31 = vunpack.i.h.bf16 %v882_v29  ;;  %v883_v10 = vunpack.i.l.bf16 %v882_v29  ;;  %774 = vmatprep.subr.bf16.mxu0 %v773_v26 }
  0xaa   :  { %v210_v34 = vpop.permute.xlu1 %209  ;;  %v192_v1 = vsel %vm190_vm5, %v883_v10, %v884_v31  ;;  %v193_v37 = vsel %vm190_vm5, %v849_v52, %v883_v10 }
  0xab   :  { %v189_v40 = vpop.permute.xlu0 %188  ;;  %776 = vmatpush1.bf16.msra.mxu0 %v775_v43  ;;  %v761_v42 = vpack.c.bf16 %v192_v1, %v167_v32  ;;  %v763_v44 = vpack.c.bf16 %v193_v37, %v168_v35 }
  0xac   :  { %v191_v54 = vsel %vm190_vm5, %v884_v31, %v189_v40  ;;  %v196_v49 = vsel %vm190_vm5, %v189_v40, %v1078_v60  ;;  %v218_v60 = vsel %vm215_vm7, %v1119_v16, %v210_v34  ;;  %v732_v16 = vld [vmem:[%s1268_s1 + $0x30] ss:$8 sm:$0x30] }
  0xad   :  { %v777_v57 = vpack.c.bf16 %v196_v49, %v171_v46  ;;  %v779_v52 = vpack.c.bf16 %v191_v54, %v166_v8  ;;  %762 = vmatprep.subr.bf16.mxu1 %v761_v42  ;;  %v503_v14 = vor.u32 %v732_v16, %v731_v51  ;;  %v575_v51 = vld [vmem:[%s1269_s2] sm:$0xff] }
  0xae   :  { %764 = vmatpush1.bf16.msra.mxu1 %v763_v44  ;;  %v214_v20 = vpop.permute.xlu1 %213 }
  0xaf   :  { %v212_v21 = vpop.permute.xlu0 %211  ;;  %778 = vmatprep.subr.bf16.mxu0 %v777_v57  ;;  %v221_v48 = vsel %vm215_vm7, %v214_v20, %v204_v3  ;;  %v508_v56 = vrot.slane %v503_v14, %v507_v53  ;;  %v512_v30 = vrot.slane %v503_v14, %v511_v55  ;;  %v516_v3 = vrot.slane %v503_v14, %v515_v61 }
  0xb0   :  { %780 = vmatpush1.bf16.msra.mxu0 %v779_v52  ;;  %v217_v63 = vsel %vm215_vm7, %v210_v34, %v212_v21  ;;  %v216_v13 = vsel %vm215_vm7, %v212_v21, %v214_v20  ;;  %v524_v12 = vrot.slane %v503_v14, %v523_v2  ;;  %v528_v41 = vrot.slane %v503_v14, %v527_v15 }
  0xb1   :  { %374 = vmatprep.subr.mxu1 %v217_v63  ;;  %445 = vmatprep.subr.mxu0 %v221_v48  ;;  %v901_v21 = vmov 0   ;;  %v903_v55 = vmov 2  }
  0xb2   :  { %375 = vmatpush1.msra.mxu1 %v218_v60  ;;  %885 = vset.pattern.permute.xlu1 %v901_v21 }
  0xb3   :  { %729 = vmatmul.mubr.msk.f32.vlgmr.msra.gmra.mrb[0].mxu1 %vm283_vm8, %v1141_v4 }
  0xb4   :  { %446 = vmatpush1.msra.mxu0 %v216_v13  ;;  %v902_v13 = vmov 1  }
  0xb5   :  { %730 = vmatmul.mubr.msk.f32.vlgmr.msra.gmra.mrb[2].mxu0 %vm283_vm8, %v1141_v4  ;;  %v520_v4 = vrot.slane %v503_v14, %v519_v62  ;;  %886 = vset.pattern.permute.xlu0 %v902_v13 }
 0x175   :  { %v1221_v23 = vpop.f32.mrb[0].mxu0 }
 0x176   :  { %v535_v33 = vmul.f32 %v508_v56, %v1221_v23  ;;  %v1224_v28 = vpop.f32.mrb[1].mxu0 }
 0x177   :  { %v536_v58 = vmul.f32 %v512_v30, %v1224_v28 }
 0x179   :  { %v541_v59 = vadd.f32 %v536_v58, %v535_v33 }
 0x186   :  { %v1231_v18 = vpop.f32.mrb[0].mxu1 }
 0x187   :  { %v537_v19 = vmul.f32 %v516_v3, %v1231_v18  ;;  %v1234_v5 = vpop.f32.mrb[1].mxu1 }
 0x188   :  { %v538_v6 = vmul.f32 %v520_v4, %v1234_v5  ;;  %v1237_v9 = vpop.f32.mrb[2].mxu0 }
 0x189   :  { %v542_v39 = vadd.f32 %v541_v59, %v537_v19  ;;  %v539_v36 = vmul.f32 %v524_v12, %v1237_v9  ;;  %v1240_v38 = vpop.f32.mrb[3].mxu0 }
 0x18a   :  { %v540_v22 = vmul.f32 %v528_v41, %v1240_v38 }
 0x18b   :  { %v543_v17 = vadd.f32 %v542_v39, %v538_v6 }
 0x18d   :  { %v544_v24 = vadd.f32 %v543_v17, %v539_v36 }
 0x18f   :  { %v545_v25 = vadd.f32 %v544_v24, %v540_v22 }
 0x191   :  { %546 = vadd.xlane.f32.xlu0 %v545_v25 }
 0x21e   :  { %v547_v45 = vpop.xlane.xlu0 %546 }
 0x21f   :  { %v548_v47 = vmul.f32 0.001953125, %v547_v45 }
 0x221   :  { %v549_v26 = vsub.f32 %v1221_v23, %v548_v47  ;;  %v550_v27 = vsub.f32 %v1224_v28, %v548_v47  ;;  %v551_v7 = vsub.f32 %v1231_v18, %v548_v47  ;;  %v552_v0 = vsub.f32 %v1234_v5, %v548_v47 }
 0x222   :  { %v553_v29 = vsub.f32 %v1237_v9, %v548_v47  ;;  %v554_v43 = vsub.f32 %v1240_v38, %v548_v47 }
 0x223   :  { %v555_v31 = vmul.f32 %v549_v26, %v508_v56  ;;  %v556_v10 = vmul.f32 %v550_v27, %v512_v30  ;;  %v557_v32 = vmul.f32 %v551_v7, %v516_v3  ;;  %v558_v34 = vmul.f32 %v552_v0, %v520_v4  ;;  %v613_v56 = vld [vmem:[%s1269_s2] sm:$0x1] }
 0x224   :  { %v559_v37 = vmul.f32 %v553_v29, %v524_v12  ;;  %v560_v44 = vmul.f32 %v554_v43, %v528_v41  ;;  %v904_v30 = vmov 3  }
 0x225   :  { %v561_v1 = vmul.f32 %v555_v31, %v555_v31  ;;  %v562_v35 = vmul.f32 %v556_v10, %v556_v10  ;;  %v563_v40 = vmul.f32 %v557_v32, %v557_v32  ;;  %v564_v8 = vmul.f32 %v558_v34, %v558_v34 }
 0x226   :  { %v565_v54 = vmul.f32 %v559_v37, %v559_v37  ;;  %v566_v57 = vmul.f32 %v560_v44, %v560_v44 }
 0x227   :  { %v567_v42 = vadd.f32 %v562_v35, %v561_v1 }
 0x229   :  { %v568_v46 = vadd.f32 %v567_v42, %v563_v40  ;;  %v905_v42 = vmov 1966171168  }
 0x22a   :  { %v682_v44 = vunpack.c.l.s4 %v905_v42 }
 0x22b   :  { %v569_v49 = vadd.f32 %v568_v46, %v564_v8 }
 0x22d   :  { %v570_v52 = vadd.f32 %v569_v49, %v565_v54 }
 0x22f   :  { %v571_v20 = vadd.f32 %v570_v52, %v566_v57 }
 0x231   :  { %572 = vadd.xlane.f32.xlu1 %v571_v20 }
 0x2be   :  { %v573_v48 = vpop.xlane.xlu1 %572 }
 0x2bf   :  { %v574_v63 = vmul.f32 0.001953125, %v573_v48 }
 0x2c1   :  { %v576_v60 = vadd.f32 1e-05, %v574_v63 }
 0x2c3   :  { %890 = vrsqrt.f32 %v576_v60  ;;  %v683_v60 = vunpack.c.0.s8 %v682_v44 }
 0x2cd   :  { %v891_v16 = vpop.eup %890 }
 0x2ce   :  { %v578_v14 = vmul.f32 %v891_v16, %v575_v51 }
 0x2d0   :  { %587 = vperm.xlu1 %885, %v578_v14   ;;  %v579_v53 = vmul.f32 %v578_v14, %v548_v47 }
 0x2d2   :  { %581 = vrot.lane.b32.xlu0 %v579_v53, %s894_s22 }
 0x2d4   :  { %887 = vset.pattern.permute.xlu1 %v903_v55 }
 0x2d5   :  { %616 = vperm.xlu1 %887, %v575_v51  }
 0x2d9   :  { %888 = vset.pattern.permute.xlu1 %v904_v30 }
 0x2da   :  { %663 = vperm.xlu1 %888, %v613_v56  }
 0x344   :  { %v582_v33 = vpop.permute.xlu0 %581 }
 0x345   :  { %v584_v58 = vsub.f32 %v575_v51, %v582_v33 }
 0x347   :  { %598 = vperm.xlu0 %886, %v584_v58  }
 0x34b   :  { %889 = vset.pattern.permute.xlu0 %v904_v30 }
 0x34f   :  { %v588_v59 = vpop.permute.xlu1 %587 }
 0x350   :  { %v590_v61 = vmul.f32 %v588_v59, %v1221_v23  ;;  %v591_v62 = vmul.f32 %v588_v59, %v1224_v28  ;;  %v592_v2 = vmul.f32 %v588_v59, %v1231_v18  ;;  %v593_v3 = vmul.f32 %v588_v59, %v1234_v5 }
 0x351   :  { %v594_v4 = vmul.f32 %v588_v59, %v1237_v9  ;;  %v595_v12 = vmul.f32 %v588_v59, %v1240_v38 }
 0x354   :  { %v617_v22 = vpop.permute.xlu1 %616 }
 0x359   :  { %v664_v56 = vpop.permute.xlu1 %663 }
 0x3c6   :  { %v599_v15 = vpop.permute.xlu0 %598 }
 0x3c7   :  { %v601_v19 = vadd.f32 %v599_v15, %v590_v61  ;;  %v602_v6 = vadd.f32 %v599_v15, %v591_v62  ;;  %v603_v39 = vadd.f32 %v599_v15, %v592_v2  ;;  %v604_v36 = vadd.f32 %v599_v15, %v593_v3 }
 0x3c8   :  { %v605_v41 = vadd.f32 %v599_v15, %v594_v4  ;;  %v606_v17 = vadd.f32 %v599_v15, %v595_v12  ;;  %v686_v2 = vsub.s32 %v683_v60, %v1211_v50 }
 0x3c9   :  { %v607_v24 = vmax.f32 %v601_v19, 0.0  ;;  %v608_v23 = vmax.f32 %v602_v6, 0.0  ;;  %v609_v25 = vmax.f32 %v603_v39, 0.0  ;;  %v610_v28 = vmax.f32 %v604_v36, 0.0 }
 0x3ca   :  { %v611_v45 = vmax.f32 %v605_v41, 0.0  ;;  %v612_v18 = vmax.f32 %v606_v17, 0.0 }
 0x3cb   :  { %v619_v47 = vmul.f32 %v617_v22, %v607_v24  ;;  %v620_v5 = vmul.f32 %v617_v22, %v608_v23  ;;  %v621_v26 = vmul.f32 %v617_v22, %v609_v25  ;;  %v622_v9 = vmul.f32 %v617_v22, %v610_v28 }
 0x3cc   :  { %v623_v27 = vmul.f32 %v617_v22, %v611_v45  ;;  %v624_v38 = vmul.f32 %v617_v22, %v612_v18 }
 0x3cd   :  { %v625_v7 = vrot.slane %v619_v47, 4  ;;  %v631_v0 = vrot.slane %v620_v5, 4  ;;  %v637_v29 = vrot.slane %v621_v26, 4  ;;  %v643_v31 = vrot.slane %v622_v9, 4 }
 0x3ce   :  { %v649_v10 = vrot.slane %v623_v27, 4  ;;  %v655_v32 = vrot.slane %v624_v38, 4 }
 0x3cf   :  { %v626_v43 = vadd.f32 %v625_v7, %v619_v47  ;;  %v632_v34 = vadd.f32 %v631_v0, %v620_v5  ;;  %v638_v1 = vadd.f32 %v637_v29, %v621_v26  ;;  %v644_v35 = vadd.f32 %v643_v31, %v622_v9 }
 0x3d0   :  { %v650_v37 = vadd.f32 %v649_v10, %v623_v27  ;;  %v656_v40 = vadd.f32 %v655_v32, %v624_v38 }
 0x3d1   :  { %v627_v8 = vrot.slane %v626_v43, 2  ;;  %v633_v46 = vrot.slane %v632_v34, 2  ;;  %v639_v54 = vrot.slane %v638_v1, 2  ;;  %v645_v49 = vrot.slane %v644_v35, 2 }
 0x3d2   :  { %v651_v57 = vrot.slane %v650_v37, 2  ;;  %v657_v52 = vrot.slane %v656_v40, 2 }
 0x3d3   :  { %v628_v20 = vadd.f32 %v627_v8, %v626_v43  ;;  %v634_v21 = vadd.f32 %v633_v46, %v632_v34  ;;  %v640_v48 = vadd.f32 %v639_v54, %v638_v1  ;;  %v646_v63 = vadd.f32 %v645_v49, %v644_v35 }
 0x3d4   :  { %v652_v13 = vadd.f32 %v651_v57, %v650_v37  ;;  %v658_v51 = vadd.f32 %v657_v52, %v656_v40 }
 0x3d5   :  { %v629_v16 = vrot.slane %v628_v20, 1  ;;  %v635_v14 = vrot.slane %v634_v21, 1  ;;  %v641_v53 = vrot.slane %v640_v48, 1  ;;  %v647_v55 = vrot.slane %v646_v63, 1 }
 0x3d6   :  { %v653_v30 = vrot.slane %v652_v13, 1  ;;  %v659_v33 = vrot.slane %v658_v51, 1 }
 0x3d7   :  { %v630_v58 = vadd.f32 %v629_v16, %v628_v20  ;;  %v636_v59 = vadd.f32 %v635_v14, %v634_v21  ;;  %v642_v61 = vadd.f32 %v641_v53, %v640_v48  ;;  %v648_v62 = vadd.f32 %v647_v55, %v646_v63 }
 0x3d8   :  { %v654_v3 = vadd.f32 %v653_v30, %v652_v13  ;;  %v660_v4 = vadd.f32 %v659_v33, %v658_v51 }
 0x3d9   :  { %v666_v12 = vadd.f32 %v664_v56, %v630_v58  ;;  %v667_v15 = vadd.f32 %v664_v56, %v636_v59  ;;  %v668_v19 = vadd.f32 %v664_v56, %v642_v61  ;;  %v669_v6 = vadd.f32 %v664_v56, %v648_v62 }
 0x3da   :  { %v670_v39 = vadd.f32 %v664_v56, %v654_v3  ;;  %v671_v36 = vadd.f32 %v664_v56, %v660_v4 }
 0x3db   :  { %v678_v41 = vcombine.low %v666_v12, %v667_v15  ;;  %v679_v17 = vcombine.low %v668_v19, %v669_v6 }
 0x3dc   :  { %v680_v22 = vcombine.low %v670_v39, %v671_v36 }
 0x3dd   :  { %v687_v24 = vrot.slane %v678_v41, %v686_v2  ;;  %v694_v23 = vrot.slane %v679_v17, %v686_v2 }
 0x3de   :  { %v701_v25 = vrot.slane %v680_v22, %v686_v2 }
 0x3df   :  { %v702_v28 = vcombine.low %v687_v24, %v694_v23 }
 0x3e0   :  { %v716_v18 = vrot.slane %v701_v25, %v686_v2 }
 0x3e1   :  { %v709_v45 = vrot.slane %v702_v28, %v686_v2 }
 0x3e3   :  { %v717_v50 = vcombine.low %v709_v45, %v716_v18 }
 0x3e5   :  { %723 = vst.msk [vmem:[%s1270_s3] sm:$0x3f] %vm721_vm9, %v717_v50 }

</bundles_post_ra>
